<compile_context>
chip_gen: v6e
topology: v6e:2x2x1
jax: 0.10.0
libtpu: 0.0.40
codegen_flags: <defaults>
</compile_context>

<pallas_src>
import functools

import jax
import jax.numpy as jnp
from jax.experimental import pallas as pl
from jax.experimental.pallas import tpu as pltpu


def _round_up(v, m):
    return (v + m - 1) // m * m


def _model_loss_kernel(x_ref, w_ref, b_ref, y_ref, nll_ref, preds_ref,
                       *, num_classes, padded_classes):
    # ---- model_: preds = x @ W + b  (bf16 operands on the MXU, f32 accumulate) ----
    logits = jnp.dot(x_ref[...], w_ref[...], preferred_element_type=jnp.float32)
    logits = logits + b_ref[...]                                  # (TM, Cp) f32
    preds_ref[...] = logits.astype(preds_ref.dtype)               # lane-dense store

    # ---- loss_fn_: per-row CrossEntropy NLL term ----
    # (mean reduction is done in the wrapper so this grid axis stays "parallel")
    col = jax.lax.broadcasted_iota(jnp.int32, logits.shape, 1)    # (TM, Cp)
    if padded_classes > num_classes:
        # Mask lane-padding classes out of the log-sum-exp (statically skipped
        # when there is no class padding).
        masked = jnp.where(col < num_classes, logits, jnp.float32(-1e30))
    else:
        masked = logits

    m = jnp.max(masked, axis=-1, keepdims=True)                   # (TM, 1)
    shifted = masked - m
    lse = jnp.log(jnp.sum(jnp.exp(shifted), axis=-1, keepdims=True))
    # Picked-label term straight from `shifted`; labels are always < num_classes
    # so a padded lane can never be selected.
    picked = jnp.sum(jnp.where(col == y_ref[...], shifted, 0.0),
                     axis=-1, keepdims=True)                      # (TM, 1)
    nll_ref[...] = lse - picked


def model_loss_cls_forward(x, w, b, labels):
    """Returns (loss, preds) exactly like model_loss_cls.forward(x, labels)."""
    B, H = x.shape
    C = w.shape[1]

    # Lane (class) padding: 128 for small C, 256 once C exceeds 128 so the
    # 256-wide MXU tiles on v6e/v7x are fully filled (v5e just runs two passes).
    lane = 128 if C <= 128 else 256
    Cp = _round_up(C, lane)

    # Generation-aware VMEM budget (v7x: 64 MiB physical, v5e/v6e: 128 MiB).
    try:
        vmem_cap = int(pltpu.get_tpu_info().vmem_capacity_bytes)
    except Exception:  # pragma: no cover - conservative fallback
        vmem_cap = 64 * 1024 * 1024
    budget = min(int(vmem_cap * 0.75), 100 * 1024 * 1024)

    # VMEM accounting (assume double-buffered W/b as the conservative case even
    # though single buffering is requested):
    resident = 2 * (H * Cp * 2 + Cp * 4)                      # W bf16 + b f32
    per_row = 2 * (H * 2 + Cp * 4 + 4 + 4)                    # x bf16, preds f32, nll, y (x2 bufs)
    if budget > resident:
        tm_cap = max(8, ((budget - resident) // per_row) // 8 * 8)
    else:
        tm_cap = 8
    TM = int(min(1024, tm_cap, _round_up(B, 8)))
    Bp = _round_up(B, TM)
    grid = (Bp // TM,)

    # Pad + cast inputs ONCE in the wrapper (no per-step casts inside the kernel).
    x_p = jnp.zeros((Bp, H), jnp.bfloat16).at[:B, :].set(x.astype(jnp.bfloat16))
    w_p = jnp.zeros((H, Cp), jnp.bfloat16).at[:, :C].set(w.astype(jnp.bfloat16))
    b_p = jnp.zeros((1, Cp), jnp.float32).at[0, :C].set(b.astype(jnp.float32))
    y_p = jnp.zeros((Bp, 1), jnp.int32).at[:B, 0].set(labels.astype(jnp.int32))

    kernel = functools.partial(_model_loss_kernel, num_classes=C, padded_classes=Cp)

    def _call(single_buffer_invariants):
        if single_buffer_invariants:
            # Grid-invariant residents: single buffer saves a full H x Cp VMEM copy.
            w_spec = pl.BlockSpec((H, Cp), lambda i: (0, 0), pipeline_mode=pl.Buffered(1))
            b_spec = pl.BlockSpec((1, Cp), lambda i: (0, 0), pipeline_mode=pl.Buffered(1))
        else:
            w_spec = pl.BlockSpec((H, Cp), lambda i: (0, 0))
            b_spec = pl.BlockSpec((1, Cp), lambda i: (0, 0))
        return pl.pallas_call(
            kernel,
            grid=grid,
            out_shape=(
                jax.ShapeDtypeStruct((Bp, 1), jnp.float32),    # per-row NLL
                jax.ShapeDtypeStruct((Bp, Cp), jnp.float32),   # preds (padded)
            ),
            in_specs=[
                pl.BlockSpec((TM, H), lambda i: (i, 0)),       # x tile (streamed)
                w_spec,                                        # W resident
                b_spec,                                        # b resident
                pl.BlockSpec((TM, 1), lambda i: (i, 0)),       # labels tile
            ],
            out_specs=(
                pl.BlockSpec((TM, 1), lambda i: (i, 0)),       # per-row NLL tile
                pl.BlockSpec((TM, Cp), lambda i: (i, 0)),      # preds tile (lane-dense)
            ),
            compiler_params=pltpu.CompilerParams(
                # No carried accumulator -> batch axis is fully parallel (v7x 2-TC).
                dimension_semantics=("parallel",),
                vmem_limit_bytes=budget,
            ),
        )(x_p, w_p, b_p, y_p)

    try:
        nll_p, preds_p = _call(True)
    except Exception:
        # Older runtimes without BlockSpec pipeline_mode support.
        nll_p, preds_p = _call(False)

    # CrossEntropyLoss mean reduction over the valid (un-padded) rows.
    loss = jnp.mean(nll_p[:B, 0])
    return loss, preds_p[:B, :C]


def _reference(x, w, b, labels):
    # Matches the kernel's bf16-operand / f32-accumulate matmul.
    logits = jnp.dot(x.astype(jnp.bfloat16), w.astype(jnp.bfloat16),
                     preferred_element_type=jnp.float32) + b[None, :].astype(jnp.float32)
    logp = jax.nn.log_softmax(logits, axis=-1)
    nll = -jnp.take_along_axis(logp, labels[:, None].astype(jnp.int32), axis=-1)[:, 0]
    return jnp.mean(nll), logits


if __name__ == "__main__":
    B, H, C = 8, 32, 16

    key = jax.random.PRNGKey(0)
    kx, kw, kb, ky = jax.random.split(key, 4)

    x = jax.random.normal(kx, (B, H), dtype=jnp.float32)
    w = jax.random.normal(kw, (H, C), dtype=jnp.float32) * 0.1
    b = jax.random.normal(kb, (C,), dtype=jnp.float32) * 0.1
    labels = jax.random.randint(ky, (B,), 0, C, dtype=jnp.int32)

    loss, preds = model_loss_cls_forward(x, w, b, labels)
    jax.block_until_ready((loss, preds))

    ref_loss, ref_preds = _reference(x, w, b, labels)
    assert jnp.allclose(loss, ref_loss, atol=1e-3, rtol=1e-3), (loss, ref_loss)
    assert jnp.allclose(preds, ref_preds, atol=1e-3, rtol=1e-3)

    print("KERNEL_OK")
</pallas_src>

<mosaic_0001>
module attributes {stable_mosaic.version = 11 : i64} {
  func.func @_model_loss_kernel(%arg0: i32, %arg1: memref<8x32xbf16, #tpu.memory_space<vmem>>, %arg2: memref<32x128xbf16, #tpu.memory_space<vmem>>, %arg3: memref<1x128xf32, #tpu.memory_space<vmem>>, %arg4: memref<8x1xi32, #tpu.memory_space<vmem>>, %arg5: memref<8x1xf32, #tpu.memory_space<vmem>>, %arg6: memref<8x128xf32, #tpu.memory_space<vmem>>) attributes {dimension_semantics = [#tpu.dimension_semantics<parallel>], iteration_bounds = array<i64: 1>, scalar_prefetch = 0 : i64, scratch_operands = 0 : i64, tpu.core_type = #tpu.core_type<tc>, window_params = [{transform_indices = @transform_0, window_bounds = array<i64: 8, 32>}, {pipeline_mode = #tpu.pipeline_mode<synchronous>, transform_indices = @transform_1, window_bounds = array<i64: 32, 128>}, {pipeline_mode = #tpu.pipeline_mode<synchronous>, transform_indices = @transform_2, window_bounds = array<i64: 1, 128>}, {transform_indices = @transform_3, window_bounds = array<i64: 8, 1>}, {transform_indices = @transform_4, window_bounds = array<i64: 8, 1>}, {transform_indices = @transform_5, window_bounds = array<i64: 8, 128>}]} {
    %c0 = arith.constant 0 : index
    %c0_0 = arith.constant 0 : index
    %0 = vector.load %arg1[%c0, %c0_0] : memref<8x32xbf16, #tpu.memory_space<vmem>>, vector<8x32xbf16>
    %c0_1 = arith.constant 0 : index
    %c0_2 = arith.constant 0 : index
    %1 = vector.load %arg2[%c0_1, %c0_2] : memref<32x128xbf16, #tpu.memory_space<vmem>>, vector<32x128xbf16>
    %cst = arith.constant dense<0.000000e+00> : vector<8x128xf32>
    %2 = tpu.matmul %0, %1, %cst {dimension_numbers = #tpu.dot_dimension_numbers<[1], [0], [0], [1], [0, 0, 1, 1], [], []>} : vector<8x32xbf16>, vector<32x128xbf16>, vector<8x128xf32> -> vector<8x128xf32>
    %c0_3 = arith.constant 0 : index
    %c0_4 = arith.constant 0 : index
    %3 = vector.load %arg3[%c0_3, %c0_4] : memref<1x128xf32, #tpu.memory_space<vmem>>, vector<1x128xf32>
    %4 = vector.broadcast %3 : vector<1x128xf32> to vector<8x128xf32>
    %5 = arith.addf %2, %4 : vector<8x128xf32>
    %c0_5 = arith.constant 0 : index
    %c0_6 = arith.constant 0 : index
    %6 = vector.load %arg6[%c0_5, %c0_6] : memref<8x128xf32, #tpu.memory_space<vmem>>, vector<8x128xf32>
    tpu.vector_store %arg6[%c0_5, %c0_6], %5 {strides = array<i32>} : memref<8x128xf32, #tpu.memory_space<vmem>>, vector<8x128xf32>,
    %7 = tpu.iota {dimensions = array<i32: 1>} : vector<8x128xi32>
    %c16_i32 = arith.constant 16 : i32
    %8 = vector.broadcast %c16_i32 : i32 to vector<8x128xi32>
    %9 = arith.cmpi slt, %7, %8 : vector<8x128xi32>
    %cst_7 = arith.constant -1.000000e+30 : f32
    %10 = vector.broadcast %cst_7 : f32 to vector<8x128xf32>
    %11 = arith.select %9, %5, %10 : vector<8x128xi1>, vector<8x128xf32>
    %cst_8 = arith.constant dense<0xFF800000> : vector<8xf32>
    %12 = vector.multi_reduction <maximumf>, %11, %cst_8 [1] : vector<8x128xf32> to vector<8xf32>
    %13 = vector.shape_cast %12 : vector<8xf32> to vector<8x1xf32>
    %14 = vector.broadcast %13 : vector<8x1xf32> to vector<8x128xf32>
    %15 = arith.subf %11, %14 : vector<8x128xf32>
    %16 = math.exp %15 : vector<8x128xf32>
    %cst_9 = arith.constant dense<0.000000e+00> : vector<8xf32>
    %17 = vector.multi_reduction <add>, %16, %cst_9 [1] : vector<8x128xf32> to vector<8xf32>
    %18 = vector.shape_cast %17 : vector<8xf32> to vector<8x1xf32>
    %19 = math.log %18 : vector<8x1xf32>
    %c0_10 = arith.constant 0 : index
    %c0_11 = arith.constant 0 : index
    %20 = vector.load %arg4[%c0_10, %c0_11] : memref<8x1xi32, #tpu.memory_space<vmem>>, vector<8x1xi32>
    %21 = vector.broadcast %20 : vector<8x1xi32> to vector<8x128xi32>
    %22 = arith.cmpi eq, %7, %21 : vector<8x128xi32>
    %cst_12 = arith.constant 0.000000e+00 : f32
    %23 = vector.broadcast %cst_12 : f32 to vector<8x128xf32>
    %24 = arith.select %22, %15, %23 : vector<8x128xi1>, vector<8x128xf32>
    %cst_13 = arith.constant dense<0.000000e+00> : vector<8xf32>
    %25 = vector.multi_reduction <add>, %24, %cst_13 [1] : vector<8x128xf32> to vector<8xf32>
    %26 = vector.shape_cast %25 : vector<8xf32> to vector<8x1xf32>
    %27 = arith.subf %19, %26 : vector<8x1xf32>
    %c0_14 = arith.constant 0 : index
    %c0_15 = arith.constant 0 : index
    %28 = vector.load %arg5[%c0_14, %c0_15] : memref<8x1xf32, #tpu.memory_space<vmem>>, vector<8x1xf32>
    tpu.vector_store %arg5[%c0_14, %c0_15], %27 {strides = array<i32>} : memref<8x1xf32, #tpu.memory_space<vmem>>, vector<8x1xf32>,
    return
  }
  func.func @transform_0(%arg0: i32) -> (i32, i32) {
    %c0_i32 = arith.constant 0 : i32
    %c0_i32_0 = arith.constant 0 : i32
    return %arg0, %c0_i32 : i32, i32
  }
  func.func @transform_1(%arg0: i32) -> (i32, i32) {
    %c0_i32 = arith.constant 0 : i32
    %c0_i32_0 = arith.constant 0 : i32
    %c0_i32_1 = arith.constant 0 : i32
    return %c0_i32, %c0_i32_0 : i32, i32
  }
  func.func @transform_2(%arg0: i32) -> (i32, i32) {
    %c0_i32 = arith.constant 0 : i32
    %c0_i32_0 = arith.constant 0 : i32
    %c0_i32_1 = arith.constant 0 : i32
    return %c0_i32, %c0_i32_0 : i32, i32
  }
  func.func @transform_3(%arg0: i32) -> (i32, i32) {
    %c0_i32 = arith.constant 0 : i32
    %c0_i32_0 = arith.constant 0 : i32
    return %arg0, %c0_i32 : i32, i32
  }
  func.func @transform_4(%arg0: i32) -> (i32, i32) {
    %c0_i32 = arith.constant 0 : i32
    %c0_i32_0 = arith.constant 0 : i32
    return %arg0, %c0_i32 : i32, i32
  }
  func.func @transform_5(%arg0: i32) -> (i32, i32) {
    %c0_i32 = arith.constant 0 : i32
    %c0_i32_0 = arith.constant 0 : i32
    return %arg0, %c0_i32 : i32, i32
  }
}

module attributes {stable_mosaic.version = 11 : i64} {
  func.func @_model_loss_kernel(%arg0: i32, %arg1: memref<8x32xbf16, #tpu.memory_space<vmem>>, %arg2: memref<32x128xbf16, #tpu.memory_space<vmem>>, %arg3: memref<1x128xf32, #tpu.memory_space<vmem>>, %arg4: memref<8x1xi32, #tpu.memory_space<vmem>>, %arg5: memref<8x1xf32, #tpu.memory_space<vmem>>, %arg6: memref<8x128xf32, #tpu.memory_space<vmem>>) attributes {dimension_semantics = [#tpu.dimension_semantics<parallel>], iteration_bounds = array<i64: 1>, scalar_prefetch = 0 : i64, scratch_operands = 0 : i64, tpu.core_type = #tpu.core_type<tc>, window_params = [{transform_indices = @transform_0, window_bounds = array<i64: 8, 32>}, {pipeline_mode = #tpu.pipeline_mode<synchronous>, transform_indices = @transform_1, window_bounds = array<i64: 32, 128>}, {pipeline_mode = #tpu.pipeline_mode<synchronous>, transform_indices = @transform_2, window_bounds = array<i64: 1, 128>}, {transform_indices = @transform_3, window_bounds = array<i64: 8, 1>}, {transform_indices = @transform_4, window_bounds = array<i64: 8, 1>}, {transform_indices = @transform_5, window_bounds = array<i64: 8, 128>}]} {
    %c0 = arith.constant 0 : index
    %c0_0 = arith.constant 0 : index
    %0 = vector.load %arg1[%c0, %c0_0] : memref<8x32xbf16, #tpu.memory_space<vmem>>, vector<8x32xbf16>
    %c0_1 = arith.constant 0 : index
    %c0_2 = arith.constant 0 : index
    %1 = vector.load %arg2[%c0_1, %c0_2] : memref<32x128xbf16, #tpu.memory_space<vmem>>, vector<32x128xbf16>
    %cst = arith.constant dense<0.000000e+00> : vector<8x128xf32>
    %2 = tpu.matmul %0, %1, %cst {dimension_numbers = #tpu.dot_dimension_numbers<[1], [0], [0], [1], [0, 0, 1, 1], [], []>} : vector<8x32xbf16>, vector<32x128xbf16>, vector<8x128xf32> -> vector<8x128xf32>
    %c0_3 = arith.constant 0 : index
    %c0_4 = arith.constant 0 : index
    %3 = vector.load %arg3[%c0_3, %c0_4] : memref<1x128xf32, #tpu.memory_space<vmem>>, vector<1x128xf32>
    %4 = vector.broadcast %3 : vector<1x128xf32> to vector<8x128xf32>
    %5 = arith.addf %2, %4 : vector<8x128xf32>
    %c0_5 = arith.constant 0 : index
    %c0_6 = arith.constant 0 : index
    %6 = vector.load %arg6[%c0_5, %c0_6] : memref<8x128xf32, #tpu.memory_space<vmem>>, vector<8x128xf32>
    tpu.vector_store %arg6[%c0_5, %c0_6], %5 {strides = array<i32>} : memref<8x128xf32, #tpu.memory_space<vmem>>, vector<8x128xf32>,
    %7 = tpu.iota {dimensions = array<i32: 1>} : vector<8x128xi32>
    %c16_i32 = arith.constant 16 : i32
    %8 = vector.broadcast %c16_i32 : i32 to vector<8x128xi32>
    %9 = arith.cmpi slt, %7, %8 : vector<8x128xi32>
    %cst_7 = arith.constant -1.000000e+30 : f32
    %10 = vector.broadcast %cst_7 : f32 to vector<8x128xf32>
    %11 = arith.select %9, %5, %10 : vector<8x128xi1>, vector<8x128xf32>
    %cst_8 = arith.constant dense<0xFF800000> : vector<8xf32>
    %12 = vector.multi_reduction <maximumf>, %11, %cst_8 [1] : vector<8x128xf32> to vector<8xf32>
    %13 = vector.shape_cast %12 : vector<8xf32> to vector<8x1xf32>
    %14 = vector.broadcast %13 : vector<8x1xf32> to vector<8x128xf32>
    %15 = arith.subf %11, %14 : vector<8x128xf32>
    %16 = math.exp %15 : vector<8x128xf32>
    %cst_9 = arith.constant dense<0.000000e+00> : vector<8xf32>
    %17 = vector.multi_reduction <add>, %16, %cst_9 [1] : vector<8x128xf32> to vector<8xf32>
    %18 = vector.shape_cast %17 : vector<8xf32> to vector<8x1xf32>
    %19 = math.log %18 : vector<8x1xf32>
    %c0_10 = arith.constant 0 : index
    %c0_11 = arith.constant 0 : index
    %20 = vector.load %arg4[%c0_10, %c0_11] : memref<8x1xi32, #tpu.memory_space<vmem>>, vector<8x1xi32>
    %21 = vector.broadcast %20 : vector<8x1xi32> to vector<8x128xi32>
    %22 = arith.cmpi eq, %7, %21 : vector<8x128xi32>
    %cst_12 = arith.constant 0.000000e+00 : f32
    %23 = vector.broadcast %cst_12 : f32 to vector<8x128xf32>
    %24 = arith.select %22, %15, %23 : vector<8x128xi1>, vector<8x128xf32>
    %cst_13 = arith.constant dense<0.000000e+00> : vector<8xf32>
    %25 = vector.multi_reduction <add>, %24, %cst_13 [1] : vector<8x128xf32> to vector<8xf32>
    %26 = vector.shape_cast %25 : vector<8xf32> to vector<8x1xf32>
    %27 = arith.subf %19, %26 : vector<8x1xf32>
    %c0_14 = arith.constant 0 : index
    %c0_15 = arith.constant 0 : index
    %28 = vector.load %arg5[%c0_14, %c0_15] : memref<8x1xf32, #tpu.memory_space<vmem>>, vector<8x1xf32>
    tpu.vector_store %arg5[%c0_14, %c0_15], %27 {strides = array<i32>} : memref<8x1xf32, #tpu.memory_space<vmem>>, vector<8x1xf32>,
    return
  }
  func.func @transform_0(%arg0: i32) -> (i32, i32) {
    %c0_i32 = arith.constant 0 : i32
    %c0_i32_0 = arith.constant 0 : i32
    return %arg0, %c0_i32 : i32, i32
  }
  func.func @transform_1(%arg0: i32) -> (i32, i32) {
    %c0_i32 = arith.constant 0 : i32
    %c0_i32_0 = arith.constant 0 : i32
    %c0_i32_1 = arith.constant 0 : i32
    return %c0_i32, %c0_i32_0 : i32, i32
  }
  func.func @transform_2(%arg0: i32) -> (i32, i32) {
    %c0_i32 = arith.constant 0 : i32
    %c0_i32_0 = arith.constant 0 : i32
    %c0_i32_1 = arith.constant 0 : i32
    return %c0_i32, %c0_i32_0 : i32, i32
  }
  func.func @transform_3(%arg0: i32) -> (i32, i32) {
    %c0_i32 = arith.constant 0 : i32
    %c0_i32_0 = arith.constant 0 : i32
    return %arg0, %c0_i32 : i32, i32
  }
  func.func @transform_4(%arg0: i32) -> (i32, i32) {
    %c0_i32 = arith.constant 0 : i32
    %c0_i32_0 = arith.constant 0 : i32
    return %arg0, %c0_i32 : i32, i32
  }
  func.func @transform_5(%arg0: i32) -> (i32, i32) {
    %c0_i32 = arith.constant 0 : i32
    %c0_i32_0 = arith.constant 0 : i32
    return %arg0, %c0_i32 : i32, i32
  }
}

</mosaic_0001>

<bundles_post_ra>
// kernel: tpu_custom_call.1
= control target key start
LH: loop header
LB: loop body
LE: loop exit
PB: predicated region body
PF: predicated region fallthrough
CT: control target
= control target key end

     0   :  { %11 = vsyncpa [#allocation3], 0  ;;  %s275_s0 = inlined_call_operand.vmem [shape: bf16[8,32], index: 0, kind: input, shape index: {}]   ;;  %s276_s1 = inlined_call_operand.hbm [shape: bf16[32,128], index: 1, kind: input, shape index: {}]   ;;  %s277_s2 = inlined_call_operand.vmem [shape: f32[1,128], index: 2, kind: input, shape index: {}]   ;;  %s278_s3 = inlined_call_operand.vmem [shape: s32[8,1], index: 3, kind: input, shape index: {}]   ;;  %s279_s4 = inlined_call_operand.vmem [shape: f32[8,1], index: 4, kind: output, shape index: {0}]   ;;  %s280_s5 = inlined_call_operand.hbm [shape: f32[8,128], index: 5, kind: output, shape index: {1}]  }
   0x1   :  { %12 = vsyncpa [#allocation4], 0  ;;  %s220_s18 = smov [#allocation2]  }
   0x2   :  { %s20_s19 = sshll.u32 %s220_s18, 4  ;;  %s21_s19 = int_to_ptr.vmem [resolvable:$true] %s20_s19 }
   0x3   :  { %s184_s20 = scalar_lea.vmem %s21_s19, 256  ;;  %p189_p1 = scmp.lt.s32.totalorder %s21_s19, %s21_s19 }
   0x4   :  { %p185_p0 = scmp.ne.s32.totalorder %s21_s19, %s184_s20  ;;  %p190_p2 = scmp.lt.s32.totalorder %s184_s20, %s184_s20 }
   0x6   :  { %p191_p3 = por %p190_p2, %p189_p1 }
   0x8   :  { %p192_p4 = pnand %p191_p3, %p185_p0 }
   0xa   :  { %195 = shalt.err (!%p192_p4)
}
   0xb   :  { %s221_s21 = smov 64   ;;  %s222_s22 = smov 4  }
   0xc   :  { %26 = dma.hbm_to_vmem [thread:$0]  %s276_s1, 256, %s21_s19, [#allocation3], %s221_s21, %s221_s21, %s222_s22  }
   0xd   :  { %216 = dma.done.wait [#allocation3], 256  }
   0xe   :  { %217 = vsyncadd [#allocation3], 4294967040  ;;  %v223_v0 = vmov 0.0   ;;  %vm224_vm0 = vmmov 0   ;;  %v170_v1 = vld [vmem:[#allocation2 + $0x8] sm:$0xff]   ;;  %v171_v2 = vld [vmem:[#allocation2] sm:$0xff]   ;;  %v104_v5 = vlaneseq }
   0xf   :  { %154 = vmatprep.subr.bf16.mxu0 %v223_v0  ;;  %158 = vmatprep.mubr.msk.bf16.mxu0 %vm224_vm0, %v223_v0  ;;  %v35_v3 = vld [vmem:[%s275_s0] sm:$0xf]  ;;  %vm59_vm1 = vcmask 261120   ;;  %v225_v4 = vmov 0  }
  0x10   :  { %155 = vmatpush3.bf16.msra.mxu0 %v170_v1  ;;  %169 = vset.pattern.permute.xlu0 %v225_v4  ;;  %v105_v6 = vand.u32 127, %v104_v5  ;;  %v147_v7 = vld [vmem:[%s277_s2] ss:$0 sm:$0xff]  ;;  %s226_s2 = smov [#allocation5]  }
  0x11   :  { %156 = vmatprep.subr.bf16.mxu0 %v223_v0  ;;  %v117_v14 = vld [vmem:[%s278_s3] sm:$0xff]  ;;  %s136_s29 = sshll.u32 %s226_s2, 4  ;;  %s137_s29 = int_to_ptr.vmem [resolvable:$true] %s136_s29 }
  0x12   :  { %vm106_vm2 = vcmp.lt.s32.totalorder %v105_v6, 16  ;;  %s196_s30 = scalar_lea.vmem %s137_s29, 128  ;;  %p201_p6 = scmp.lt.s32.totalorder %s137_s29, %s137_s29 }
  0x13   :  { %p197_p5 = scmp.ne.s32.totalorder %s137_s29, %s196_s30  ;;  %p202_p7 = scmp.lt.s32.totalorder %s196_s30, %s196_s30 }
  0x14   :  { %157 = vmatpush3.bf16.msra.mxu0 %v171_v2 }
  0x15   :  { %p203_p8 = por %p202_p7, %p201_p6 }
  0x17   :  { %159 = vmatmul.mubr.msk.bf16.vlgmr.msra.gmra.mxu0 %vm59_vm1, %v35_v3  ;;  %p204_p9 = pnand %p203_p8, %p197_p5 }
  0xd7   :  { %v97_v8 = vpop.f32.mrf.mxu0 }
  0xd8   :  { %v98_v9 = vadd.f32 %v147_v7, %v97_v8 }
  0xd9   :  { %v160_v10 = vpop.f32.mrf.mxu0 }
  0xda   :  { %103 = vst [vmem:[#allocation5] sm:$0xff] %v98_v9  ;;  %v107_v11 = vsel %vm106_vm2, %v98_v9, -1e+30 }
  0xdb   :  { %108 = vmax.xlane.f32.xlu0 %v107_v11  ;;  %v100_v12 = vpop.f32.mrf.mxu0 }
  0xdd   :  { %v161_v13 = vpop.f32.mrf.mxu0 }
  0xf1   :  { %119 = vperm.xlu0 %169, %v117_v14  }
 0x164   :  { %v109_v15 = vpop.xlane.xlu0 %108 }
 0x165   :  { %v110_v16 = vsub.f32 %v107_v11, %v109_v15 }
 0x167   :  { %v111_v17 = vmul.f32 1.442695, %v110_v16 }
 0x169   :  { %172 = vpow2.f32 %v111_v17 }
 0x16c   :  { %v120_v18 = vpop.permute.xlu0 %119 }
 0x16d   :  { %vm121_vm3 = vcmp.eq.s32.totalorder %v105_v6, %v120_v18 }
 0x16e   :  { %v122_v20 = vsel %vm121_vm3, %v110_v16, 0.0 }
 0x176   :  { %v173_v19 = vpop.eup %172 }
 0x177   :  { %113 = vadd.xlane.f32.xlu1 %v173_v19 }
 0x17b   :  { %123 = vadd.xlane.f32.xlu1 %v122_v20 }
 0x17c   :  { %207 = shalt.err (!%p204_p9)
}
 0x17d   :  { %139 = dma.vmem_to_hbm [thread:$0]  %s137_s29, 128, %s280_s5, [#allocation4]   ;;  %vm126_vm4 = vcmask 7168  }
 0x200   :  { %v114_v21 = vpop.xlane.xlu1 %113 }
 0x201   :  { %174 = vlog2.f32 %v114_v21 }
 0x204   :  { %v124_v24 = vpop.xlane.xlu1 %123 }
 0x20e   :  { %v175_v22 = vpop.eup %174 }
 0x20f   :  { %v116_v23 = vmul.f32 0.6931472, %v175_v22 }
 0x211   :  { %v125_v25 = vsub.f32 %v116_v23, %v124_v24 }
 0x213   :  { %127 = vst.msk [vmem:[%s279_s4] sm:$0xff] %vm126_vm4, %v125_v25 }
 0x214   :  { %218 = dma.done.wait [#allocation4], 128  }
 0x215   :  { %219 = vsyncadd [#allocation4], 4294967168 }
 0x216   :  { %145 = vsyncpa [#allocation3], 1 }
 0x217   :  { %146 = vsyncpa [#allocation4], 1 }

// kernel: tpu_custom_call.1
= control target key start
LH: loop header
LB: loop body
LE: loop exit
PB: predicated region body
PF: predicated region fallthrough
CT: control target
= control target key end

     0   :  { %11 = vsyncpa [#allocation3], 0  ;;  %s275_s0 = inlined_call_operand.vmem [shape: bf16[8,32], index: 0, kind: input, shape index: {}]   ;;  %s276_s1 = inlined_call_operand.hbm [shape: bf16[32,128], index: 1, kind: input, shape index: {}]   ;;  %s277_s2 = inlined_call_operand.vmem [shape: f32[1,128], index: 2, kind: input, shape index: {}]   ;;  %s278_s3 = inlined_call_operand.vmem [shape: s32[8,1], index: 3, kind: input, shape index: {}]   ;;  %s279_s4 = inlined_call_operand.vmem [shape: f32[8,1], index: 4, kind: output, shape index: {0}]   ;;  %s280_s5 = inlined_call_operand.hbm [shape: f32[8,128], index: 5, kind: output, shape index: {1}]  }
   0x1   :  { %12 = vsyncpa [#allocation4], 0  ;;  %s220_s18 = smov [#allocation2]  }
   0x2   :  { %s20_s19 = sshll.u32 %s220_s18, 4  ;;  %s21_s19 = int_to_ptr.vmem [resolvable:$true] %s20_s19 }
   0x3   :  { %s184_s20 = scalar_lea.vmem %s21_s19, 256  ;;  %p189_p1 = scmp.lt.s32.totalorder %s21_s19, %s21_s19 }
   0x4   :  { %p185_p0 = scmp.ne.s32.totalorder %s21_s19, %s184_s20  ;;  %p190_p2 = scmp.lt.s32.totalorder %s184_s20, %s184_s20 }
   0x6   :  { %p191_p3 = por %p190_p2, %p189_p1 }
   0x8   :  { %p192_p4 = pnand %p191_p3, %p185_p0 }
   0xa   :  { %195 = shalt.err (!%p192_p4)
}
   0xb   :  { %s221_s21 = smov 64   ;;  %s222_s22 = smov 4  }
   0xc   :  { %26 = dma.hbm_to_vmem [thread:$0]  %s276_s1, 256, %s21_s19, [#allocation3], %s221_s21, %s221_s21, %s222_s22  }
   0xd   :  { %216 = dma.done.wait [#allocation3], 256  }
   0xe   :  { %217 = vsyncadd [#allocation3], 4294967040  ;;  %v223_v0 = vmov 0.0   ;;  %vm224_vm0 = vmmov 0   ;;  %v170_v1 = vld [vmem:[#allocation2 + $0x8] sm:$0xff]   ;;  %v171_v2 = vld [vmem:[#allocation2] sm:$0xff]   ;;  %v104_v5 = vlaneseq }
   0xf   :  { %154 = vmatprep.subr.bf16.mxu0 %v223_v0  ;;  %158 = vmatprep.mubr.msk.bf16.mxu0 %vm224_vm0, %v223_v0  ;;  %v35_v3 = vld [vmem:[%s275_s0] sm:$0xf]  ;;  %vm59_vm1 = vcmask 261120   ;;  %v225_v4 = vmov 0  }
  0x10   :  { %155 = vmatpush3.bf16.msra.mxu0 %v170_v1  ;;  %169 = vset.pattern.permute.xlu0 %v225_v4  ;;  %v105_v6 = vand.u32 127, %v104_v5  ;;  %v147_v7 = vld [vmem:[%s277_s2] ss:$0 sm:$0xff]  ;;  %s226_s2 = smov [#allocation5]  }
  0x11   :  { %156 = vmatprep.subr.bf16.mxu0 %v223_v0  ;;  %v117_v14 = vld [vmem:[%s278_s3] sm:$0xff]  ;;  %s136_s29 = sshll.u32 %s226_s2, 4  ;;  %s137_s29 = int_to_ptr.vmem [resolvable:$true] %s136_s29 }
  0x12   :  { %vm106_vm2 = vcmp.lt.s32.totalorder %v105_v6, 16  ;;  %s196_s30 = scalar_lea.vmem %s137_s29, 128  ;;  %p201_p6 = scmp.lt.s32.totalorder %s137_s29, %s137_s29 }
  0x13   :  { %p197_p5 = scmp.ne.s32.totalorder %s137_s29, %s196_s30  ;;  %p202_p7 = scmp.lt.s32.totalorder %s196_s30, %s196_s30 }
  0x14   :  { %157 = vmatpush3.bf16.msra.mxu0 %v171_v2 }
  0x15   :  { %p203_p8 = por %p202_p7, %p201_p6 }
  0x17   :  { %159 = vmatmul.mubr.msk.bf16.vlgmr.msra.gmra.mxu0 %vm59_vm1, %v35_v3  ;;  %p204_p9 = pnand %p203_p8, %p197_p5 }
  0xd7   :  { %v97_v8 = vpop.f32.mrf.mxu0 }
  0xd8   :  { %v98_v9 = vadd.f32 %v147_v7, %v97_v8 }
  0xd9   :  { %v160_v10 = vpop.f32.mrf.mxu0 }
  0xda   :  { %103 = vst [vmem:[#allocation5] sm:$0xff] %v98_v9  ;;  %v107_v11 = vsel %vm106_vm2, %v98_v9, -1e+30 }
  0xdb   :  { %108 = vmax.xlane.f32.xlu0 %v107_v11  ;;  %v100_v12 = vpop.f32.mrf.mxu0 }
  0xdd   :  { %v161_v13 = vpop.f32.mrf.mxu0 }
  0xf1   :  { %119 = vperm.xlu0 %169, %v117_v14  }
 0x164   :  { %v109_v15 = vpop.xlane.xlu0 %108 }
 0x165   :  { %v110_v16 = vsub.f32 %v107_v11, %v109_v15 }
 0x167   :  { %v111_v17 = vmul.f32 1.442695, %v110_v16 }
 0x169   :  { %172 = vpow2.f32 %v111_v17 }
 0x16c   :  { %v120_v18 = vpop.permute.xlu0 %119 }
 0x16d   :  { %vm121_vm3 = vcmp.eq.s32.totalorder %v105_v6, %v120_v18 }
 0x16e   :  { %v122_v20 = vsel %vm121_vm3, %v110_v16, 0.0 }
 0x176   :  { %v173_v19 = vpop.eup %172 }
 0x177   :  { %113 = vadd.xlane.f32.xlu1 %v173_v19 }
 0x17b   :  { %123 = vadd.xlane.f32.xlu1 %v122_v20 }
 0x17c   :  { %207 = shalt.err (!%p204_p9)
}
 0x17d   :  { %139 = dma.vmem_to_hbm [thread:$0]  %s137_s29, 128, %s280_s5, [#allocation4]   ;;  %vm126_vm4 = vcmask 7168  }
 0x200   :  { %v114_v21 = vpop.xlane.xlu1 %113 }
 0x201   :  { %174 = vlog2.f32 %v114_v21 }
 0x204   :  { %v124_v24 = vpop.xlane.xlu1 %123 }
 0x20e   :  { %v175_v22 = vpop.eup %174 }
 0x20f   :  { %v116_v23 = vmul.f32 0.6931472, %v175_v22 }
 0x211   :  { %v125_v25 = vsub.f32 %v116_v23, %v124_v24 }
 0x213   :  { %127 = vst.msk [vmem:[%s279_s4] sm:$0xff] %vm126_vm4, %v125_v25 }
 0x214   :  { %218 = dma.done.wait [#allocation4], 128  }
 0x215   :  { %219 = vsyncadd [#allocation4], 4294967168 }
 0x216   :  { %145 = vsyncpa [#allocation3], 1 }
 0x217   :  { %146 = vsyncpa [#allocation4], 1 }

</bundles_post_ra>
